<compile_context>
chip_gen: v6e
topology: v6e:2x2x1
jax: 0.10.0
libtpu: 0.0.40
codegen_flags: <defaults>
</compile_context>

<pallas_src>
import functools

import jax
import jax.numpy as jnp
from jax.experimental import pallas as pl
from jax.experimental.pallas import tpu as pltpu


def _round_up(x, m):
    return ((x + m - 1) // m) * m


def _fused_heads_kernel(x_ref, w_ref, b_ref, o_ref, *, num_heads, num_classes):
    # x_ref: (BT, F)   w_ref: (F, Cp)   b_ref: (1, Cp)   o_ref: (BT, Cp)
    logits = jnp.dot(x_ref[...], w_ref[...],
                     preferred_element_type=jnp.float32)
    logits = logits + b_ref[...].astype(jnp.float32)

    parts = []
    for h in range(num_heads):  # static, small H -> unrolled at trace time
        lg = logits[:, h * num_classes:(h + 1) * num_classes]
        m = jnp.max(lg, axis=-1, keepdims=True)
        e = jnp.exp(lg - m)
        denom = jnp.sum(e, axis=-1, keepdims=True)
        # Exact reciprocal; approx=True would relax the 1e-5 tolerance.
        parts.append(e * pl.reciprocal(denom))

    pad_cols = o_ref.shape[-1] - num_heads * num_classes
    if pad_cols > 0:
        parts.append(jnp.zeros((logits.shape[0], pad_cols), jnp.float32))

    # Single full-width (lane-dense) store of the whole output block.
    o_ref[...] = jnp.concatenate(parts, axis=-1).astype(o_ref.dtype)


def cluster_net5g_head_forward(x, weights, biases, kmeans_use_features=False,
                               matmul_in_bf16=False, b_tile=512):
    """x: (B, F) f32; weights: (H, F, C) f32 (already x@W layout); biases: (H, C).

    Returns the stacked (H, B, C) softmax outputs (results[h] == torch head h),
    or (H, B, F) broadcast features when kmeans_use_features=True.
    """
    H, F, C = weights.shape
    B = x.shape[0]

    if kmeans_use_features:
        # Module returns the raw features for every sub-head.
        return jnp.broadcast_to(x[None], (H, B, F))

    HC = H * C
    Cp = _round_up(HC, 128)

    # Fuse all heads into one (F, H*C) weight matrix, padded lane-dense to Cp.
    w_fused = jnp.transpose(weights, (1, 0, 2)).reshape(F, HC)
    w_fused = jnp.pad(w_fused, ((0, 0), (0, Cp - HC)))
    b_fused = jnp.pad(biases.reshape(1, HC).astype(jnp.float32),
                      ((0, 0), (0, Cp - HC)))

    # Batch tiling: one step for small B, 512-row "parallel" tiles otherwise.
    if B <= b_tile:
        bt, Bp = B, B
    else:
        bt = b_tile
        Bp = _round_up(B, bt)
    x_p = x if Bp == B else jnp.pad(x, ((0, Bp - B), (0, 0)))

    if matmul_in_bf16:
        # Halves x/W DMA bytes and uses the bf16 MXU path; softmax stays f32.
        x_p = x_p.astype(jnp.bfloat16)
        w_fused = w_fused.astype(jnp.bfloat16)

    cost = pl.CostEstimate(
        flops=2 * Bp * F * Cp,
        transcendentals=Bp * HC,
        bytes_accessed=(x_p.size * x_p.dtype.itemsize
                        + w_fused.size * w_fused.dtype.itemsize
                        + b_fused.size * 4
                        + Bp * Cp * 4),
    )

    kernel = functools.partial(_fused_heads_kernel,
                               num_heads=H, num_classes=C)

    out = pl.pallas_call(
        kernel,
        out_shape=jax.ShapeDtypeStruct((Bp, Cp), jnp.float32),
        grid_spec=pltpu.PrefetchScalarGridSpec(
            num_scalar_prefetch=0,
            grid=(Bp // bt,),
            in_specs=[
                pl.BlockSpec((bt, F), lambda i: (i, 0)),   # batch tile of x
                pl.BlockSpec((F, Cp), lambda i: (0, 0)),   # fused weights (resident)
                pl.BlockSpec((1, Cp), lambda i: (0, 0)),   # fused bias (resident)
            ],
            out_specs=pl.BlockSpec((bt, Cp), lambda i: (i, 0)),
        ),
        compiler_params=pltpu.CompilerParams(
            dimension_semantics=("parallel",)),
        cost_estimate=cost,
    )(x_p, w_fused, b_fused)

    # Strip batch/lane padding; return stacked (H, B, C).
    return out[:B, :HC].reshape(B, H, C).transpose(1, 0, 2)


if __name__ == "__main__":
    # Small, deterministic setup consistent with the module:
    # feature dim is fixed at 512 (= 512 * BasicBlock.expansion).
    B = 2                 # batch
    F = 512               # in_features
    num_classes = 10
    num_sub_heads = 3

    key = jax.random.PRNGKey(0)
    kx, kw, kb = jax.random.split(key, 3)

    x = jax.random.normal(kx, (B, F), dtype=jnp.float32)
    # Deterministic synthetic parameters (nn.Linear-like scale), stored as
    # (H, F, C) so the kernel computes x @ W[h] (transpose of torch's (C, F)).
    weights = jax.random.normal(kw, (num_sub_heads, F, num_classes),
                                dtype=jnp.float32) * (1.0 / jnp.sqrt(F))
    biases = jax.random.normal(kb, (num_sub_heads, num_classes),
                               dtype=jnp.float32) * 0.01

    fwd = jax.jit(cluster_net5g_head_forward,
                  static_argnames=("kmeans_use_features",
                                   "matmul_in_bf16", "b_tile"))
    results = fwd(x, weights, biases)     # (H, B, C) stacked softmax outputs
    jax.block_until_ready(results)

    # Reference check in plain JAX (per-head, mirroring the torch list output).
    ok = True
    for h in range(num_sub_heads):
        ref = jax.nn.softmax(x @ weights[h] + biases[h], axis=1)
        ok &= bool(jnp.allclose(results[h], ref, atol=1e-5, rtol=1e-5))
        ok &= bool(jnp.allclose(jnp.sum(results[h], axis=1), 1.0, atol=1e-5))

    # Also check the kmeans_use_features pass-through path.
    feats = fwd(x, weights, biases, kmeans_use_features=True)
    jax.block_until_ready(feats)
    for h in range(num_sub_heads):
        ok &= bool(jnp.allclose(feats[h], x))

    if ok:
        print("KERNEL_OK")
    else:
        print("KERNEL_MISMATCH")
</pallas_src>

<mosaic_0001>
module attributes {stable_mosaic.version = 11 : i64} {
  func.func @_fused_heads_kernel(%arg0: i32, %arg1: memref<2x512xf32, #tpu.memory_space<vmem>>, %arg2: memref<512x128xf32, #tpu.memory_space<vmem>>, %arg3: memref<1x128xf32, #tpu.memory_space<vmem>>, %arg4: memref<2x128xf32, #tpu.memory_space<vmem>>) attributes {dimension_semantics = [#tpu.dimension_semantics<parallel>], iteration_bounds = array<i64: 1>, scalar_prefetch = 0 : i64, scratch_operands = 0 : i64, tpu.core_type = #tpu.core_type<tc>, window_params = [{transform_indices = @transform_0, window_bounds = array<i64: 2, 512>}, {pipeline_mode = #tpu.pipeline_mode<synchronous>, transform_indices = @transform_1, window_bounds = array<i64: 512, 128>}, {pipeline_mode = #tpu.pipeline_mode<synchronous>, transform_indices = @transform_2, window_bounds = array<i64: 1, 128>}, {transform_indices = @transform_3, window_bounds = array<i64: 2, 128>}]} {
    %c0 = arith.constant 0 : index
    %c0_0 = arith.constant 0 : index
    %0 = vector.load %arg1[%c0, %c0_0] : memref<2x512xf32, #tpu.memory_space<vmem>>, vector<2x512xf32>
    %c0_1 = arith.constant 0 : index
    %c0_2 = arith.constant 0 : index
    %1 = vector.load %arg2[%c0_1, %c0_2] : memref<512x128xf32, #tpu.memory_space<vmem>>, vector<512x128xf32>
    %cst = arith.constant dense<0.000000e+00> : vector<2x128xf32>
    %2 = tpu.matmul %0, %1, %cst {dimension_numbers = #tpu.dot_dimension_numbers<[1], [0], [0], [1], [0, 0, 1, 1], [], []>} : vector<2x512xf32>, vector<512x128xf32>, vector<2x128xf32> -> vector<2x128xf32>
    %c0_3 = arith.constant 0 : index
    %c0_4 = arith.constant 0 : index
    %3 = vector.load %arg3[%c0_3, %c0_4] : memref<1x128xf32, #tpu.memory_space<vmem>>, vector<1x128xf32>
    %4 = vector.broadcast %3 : vector<1x128xf32> to vector<2x128xf32>
    %5 = arith.addf %2, %4 : vector<2x128xf32>
    %6 = vector.extract_strided_slice %5 {offsets = [0, 0], sizes = [2, 10], strides = [1, 1]} : vector<2x128xf32> to vector<2x10xf32>
    %cst_5 = arith.constant dense<0xFF800000> : vector<2xf32>
    %7 = vector.multi_reduction <maximumf>, %6, %cst_5 [1] : vector<2x10xf32> to vector<2xf32>
    %8 = vector.shape_cast %7 : vector<2xf32> to vector<2x1xf32>
    %9 = vector.broadcast %8 : vector<2x1xf32> to vector<2x10xf32>
    %10 = arith.subf %6, %9 : vector<2x10xf32>
    %11 = math.exp %10 : vector<2x10xf32>
    %cst_6 = arith.constant dense<0.000000e+00> : vector<2xf32>
    %12 = vector.multi_reduction <add>, %11, %cst_6 [1] : vector<2x10xf32> to vector<2xf32>
    %13 = vector.shape_cast %12 : vector<2xf32> to vector<2x1xf32>
    %14 = tpu.reciprocal %13 : vector<2x1xf32> -> vector<2x1xf32>
    %15 = vector.broadcast %14 : vector<2x1xf32> to vector<2x10xf32>
    %16 = arith.mulf %11, %15 : vector<2x10xf32>
    %17 = vector.extract_strided_slice %5 {offsets = [0, 10], sizes = [2, 10], strides = [1, 1]} : vector<2x128xf32> to vector<2x10xf32>
    %cst_7 = arith.constant dense<0xFF800000> : vector<2xf32>
    %18 = vector.multi_reduction <maximumf>, %17, %cst_7 [1] : vector<2x10xf32> to vector<2xf32>
    %19 = vector.shape_cast %18 : vector<2xf32> to vector<2x1xf32>
    %20 = vector.broadcast %19 : vector<2x1xf32> to vector<2x10xf32>
    %21 = arith.subf %17, %20 : vector<2x10xf32>
    %22 = math.exp %21 : vector<2x10xf32>
    %cst_8 = arith.constant dense<0.000000e+00> : vector<2xf32>
    %23 = vector.multi_reduction <add>, %22, %cst_8 [1] : vector<2x10xf32> to vector<2xf32>
    %24 = vector.shape_cast %23 : vector<2xf32> to vector<2x1xf32>
    %25 = tpu.reciprocal %24 : vector<2x1xf32> -> vector<2x1xf32>
    %26 = vector.broadcast %25 : vector<2x1xf32> to vector<2x10xf32>
    %27 = arith.mulf %22, %26 : vector<2x10xf32>
    %28 = vector.extract_strided_slice %5 {offsets = [0, 20], sizes = [2, 10], strides = [1, 1]} : vector<2x128xf32> to vector<2x10xf32>
    %cst_9 = arith.constant dense<0xFF800000> : vector<2xf32>
    %29 = vector.multi_reduction <maximumf>, %28, %cst_9 [1] : vector<2x10xf32> to vector<2xf32>
    %30 = vector.shape_cast %29 : vector<2xf32> to vector<2x1xf32>
    %31 = vector.broadcast %30 : vector<2x1xf32> to vector<2x10xf32>
    %32 = arith.subf %28, %31 : vector<2x10xf32>
    %33 = math.exp %32 : vector<2x10xf32>
    %cst_10 = arith.constant dense<0.000000e+00> : vector<2xf32>
    %34 = vector.multi_reduction <add>, %33, %cst_10 [1] : vector<2x10xf32> to vector<2xf32>
    %35 = vector.shape_cast %34 : vector<2xf32> to vector<2x1xf32>
    %36 = tpu.reciprocal %35 : vector<2x1xf32> -> vector<2x1xf32>
    %37 = vector.broadcast %36 : vector<2x1xf32> to vector<2x10xf32>
    %38 = arith.mulf %33, %37 : vector<2x10xf32>
    %cst_11 = arith.constant 0.000000e+00 : f32
    %39 = vector.broadcast %cst_11 : f32 to vector<2x98xf32>
    %40 = tpu.concatenate %16, %27, %38, %39 in 1 : vector<2x10xf32>, vector<2x10xf32>, vector<2x10xf32>, vector<2x98xf32> -> vector<2x128xf32>
    %c0_12 = arith.constant 0 : index
    %c0_13 = arith.constant 0 : index
    %41 = vector.load %arg4[%c0_12, %c0_13] : memref<2x128xf32, #tpu.memory_space<vmem>>, vector<2x128xf32>
    tpu.vector_store %arg4[%c0_12, %c0_13], %40 {strides = array<i32>} : memref<2x128xf32, #tpu.memory_space<vmem>>, vector<2x128xf32>,
    return
  }
  func.func @transform_0(%arg0: i32) -> (i32, i32) {
    %c0_i32 = arith.constant 0 : i32
    %c0_i32_0 = arith.constant 0 : i32
    return %arg0, %c0_i32 : i32, i32
  }
  func.func @transform_1(%arg0: i32) -> (i32, i32) {
    %c0_i32 = arith.constant 0 : i32
    %c0_i32_0 = arith.constant 0 : i32
    %c0_i32_1 = arith.constant 0 : i32
    return %c0_i32, %c0_i32_0 : i32, i32
  }
  func.func @transform_2(%arg0: i32) -> (i32, i32) {
    %c0_i32 = arith.constant 0 : i32
    %c0_i32_0 = arith.constant 0 : i32
    %c0_i32_1 = arith.constant 0 : i32
    return %c0_i32, %c0_i32_0 : i32, i32
  }
  func.func @transform_3(%arg0: i32) -> (i32, i32) {
    %c0_i32 = arith.constant 0 : i32
    %c0_i32_0 = arith.constant 0 : i32
    return %arg0, %c0_i32 : i32, i32
  }
}

</mosaic_0001>

<bundles_post_ra>
// kernel: cluster_net5g_head_forward.1
= control target key start
LH: loop header
LB: loop body
LE: loop exit
PB: predicated region body
PF: predicated region fallthrough
CT: control target
= control target key end

     0   :  { %v390_v30 = vmov 1983009808   ;;  %v91_v32 = vlaneseq  ;;  %vm260_vm0 = vcmask 156752   ;;  %vm248_vm1 = vcmask 74752   ;;  %s618_s1 = inlined_call_operand.vmem [shape: f32[512,128], index: 1, kind: input, shape index: {}]   ;;  %s619_s0 = inlined_call_operand.vmem [shape: f32[2,512], index: 0, kind: input, shape index: {}]   ;;  %s620_s2 = inlined_call_operand.vmem [shape: f32[1,128], index: 2, kind: input, shape index: {}]   ;;  %s621_s3 = inlined_call_operand.vmem [shape: f32[2,128], index: 3, kind: output, shape index: {}]  }
   0x1   :  { %v46_v0 = vld [vmem:[%s618_s1 + $0xf8] sm:$0xff]  ;;  %v45_v4 = vld [vmem:[%s618_s1 + $0xf0] sm:$0xff]  ;;  %v44_v8 = vld [vmem:[%s618_s1 + $0xe8] sm:$0xff]  ;;  %v89_v31 = vunpack.c.l.s4 %v390_v30  ;;  %vm276_vm2 = vcmask 238752   ;;  %vm292_vm3 = vcmask 80896   ;;  %vm294_vm4 = vcmask 162816  }
   0x2   :  { %v78_v1 = vld [vmem:[%s618_s1 + $0x1f8] sm:$0xff]  ;;  %304 = vmatprep.subr.mxu0 %v46_v0  ;;  %v77_v5 = vld [vmem:[%s618_s1 + $0x1f0] sm:$0xff]  ;;  %v76_v9 = vld [vmem:[%s618_s1 + $0x1e8] sm:$0xff]  ;;  %v92_v42 = vshrl.u32 %v91_v32, 7  ;;  %vm296_vm5 = vcmask 244736  }
   0x3   :  { %v30_v2 = vld [vmem:[%s618_s1 + $0x78] sm:$0xff]  ;;  %339 = vmatprep.subr.mxu1 %v78_v1  ;;  %v29_v6 = vld [vmem:[%s618_s1 + $0x70] sm:$0xff]  ;;  %v28_v10 = vld [vmem:[%s618_s1 + $0x68] sm:$0xff]  ;;  %v90_v41 = vunpack.c.0.s8 %v89_v31 }
   0x4   :  { %v62_v3 = vld [vmem:[%s618_s1 + $0x178] sm:$0xff]  ;;  %305 = vmatpush3.msra.mxu0 %v30_v2  ;;  %v61_v7 = vld [vmem:[%s618_s1 + $0x170] sm:$0xff]  ;;  %v60_v11 = vld [vmem:[%s618_s1 + $0x168] sm:$0xff] }
   0x5   :  { %340 = vmatpush3.msra.mxu1 %v62_v3  ;;  %306 = vmatprep.subr.mxu0 %v45_v4  ;;  %v43_v12 = vld [vmem:[%s618_s1 + $0xe0] sm:$0xff]  ;;  %v42_v16 = vld [vmem:[%s618_s1 + $0xd8] sm:$0xff]  ;;  %v41_v20 = vld [vmem:[%s618_s1 + $0xd0] sm:$0xff]  ;;  %v93_v51 = vsub.s32 %v90_v41, %v92_v42 }
   0x6   :  { %341 = vmatprep.subr.mxu1 %v77_v5  ;;  %307 = vmatpush3.msra.mxu0 %v29_v6  ;;  %v75_v13 = vld [vmem:[%s618_s1 + $0x1e0] sm:$0xff]  ;;  %v74_v17 = vld [vmem:[%s618_s1 + $0x1d8] sm:$0xff]  ;;  %v73_v21 = vld [vmem:[%s618_s1 + $0x1d0] sm:$0xff] }
   0x7   :  { %342 = vmatpush3.msra.mxu1 %v61_v7  ;;  %308 = vmatprep.subr.mxu0 %v44_v8  ;;  %v27_v14 = vld [vmem:[%s618_s1 + $0x60] sm:$0xff]  ;;  %v26_v18 = vld [vmem:[%s618_s1 + $0x58] sm:$0xff]  ;;  %v25_v22 = vld [vmem:[%s618_s1 + $0x50] sm:$0xff] }
   0x8   :  { %343 = vmatprep.subr.mxu1 %v76_v9  ;;  %v59_v15 = vld [vmem:[%s618_s1 + $0x160] sm:$0xff]  ;;  %309 = vmatpush3.msra.mxu0 %v28_v10  ;;  %v58_v19 = vld [vmem:[%s618_s1 + $0x158] sm:$0xff]  ;;  %v57_v23 = vld [vmem:[%s618_s1 + $0x150] sm:$0xff] }
   0x9   :  { %344 = vmatpush3.msra.mxu1 %v60_v11  ;;  %310 = vmatprep.subr.mxu0 %v43_v12  ;;  %v40_v24 = vld [vmem:[%s618_s1 + $0xc8] sm:$0xff]  ;;  %v39_v28 = vld [vmem:[%s618_s1 + $0xc0] sm:$0xff]  ;;  %v38_v35 = vld [vmem:[%s618_s1 + $0xb8] sm:$0xff] }
   0xa   :  { %345 = vmatprep.subr.mxu1 %v75_v13  ;;  %311 = vmatpush3.msra.mxu0 %v27_v14  ;;  %v72_v25 = vld [vmem:[%s618_s1 + $0x1c8] sm:$0xff]  ;;  %v71_v29 = vld [vmem:[%s618_s1 + $0x1c0] sm:$0xff]  ;;  %v70_v36 = vld [vmem:[%s618_s1 + $0x1b8] sm:$0xff] }
   0xb   :  { %346 = vmatpush3.msra.mxu1 %v59_v15  ;;  %312 = vmatprep.subr.mxu0 %v42_v16  ;;  %v24_v26 = vld [vmem:[%s618_s1 + $0x48] sm:$0xff]  ;;  %v23_v33 = vld [vmem:[%s618_s1 + $0x40] sm:$0xff]  ;;  %v22_v37 = vld [vmem:[%s618_s1 + $0x38] sm:$0xff] }
   0xc   :  { %347 = vmatprep.subr.mxu1 %v74_v17  ;;  %313 = vmatpush3.msra.mxu0 %v26_v18  ;;  %v56_v27 = vld [vmem:[%s618_s1 + $0x148] sm:$0xff]  ;;  %v55_v34 = vld [vmem:[%s618_s1 + $0x140] sm:$0xff]  ;;  %v54_v38 = vld [vmem:[%s618_s1 + $0x138] sm:$0xff] }
   0xd   :  { %348 = vmatpush3.msra.mxu1 %v58_v19  ;;  %314 = vmatprep.subr.mxu0 %v41_v20  ;;  %v37_v39 = vld [vmem:[%s618_s1 + $0xb0] sm:$0xff]  ;;  %v36_v45 = vld [vmem:[%s618_s1 + $0xa8] sm:$0xff]  ;;  %v35_v49 = vld [vmem:[%s618_s1 + $0xa0] sm:$0xff] }
   0xe   :  { %349 = vmatprep.subr.mxu1 %v73_v21  ;;  %315 = vmatpush3.msra.mxu0 %v25_v22  ;;  %v69_v40 = vld [vmem:[%s618_s1 + $0x1b0] sm:$0xff]  ;;  %v68_v46 = vld [vmem:[%s618_s1 + $0x1a8] sm:$0xff]  ;;  %v67_v50 = vld [vmem:[%s618_s1 + $0x1a0] sm:$0xff] }
   0xf   :  { %350 = vmatpush3.msra.mxu1 %v57_v23  ;;  %316 = vmatprep.subr.mxu0 %v40_v24  ;;  %v21_v43 = vld [vmem:[%s618_s1 + $0x30] sm:$0xff]  ;;  %v20_v47 = vld [vmem:[%s618_s1 + $0x28] sm:$0xff]  ;;  %v19_v52 = vld [vmem:[%s618_s1 + $0x20] sm:$0xff] }
  0x10   :  { %351 = vmatprep.subr.mxu1 %v72_v25  ;;  %317 = vmatpush3.msra.mxu0 %v24_v26  ;;  %v53_v44 = vld [vmem:[%s618_s1 + $0x130] sm:$0xff]  ;;  %v52_v48 = vld [vmem:[%s618_s1 + $0x128] sm:$0xff]  ;;  %v51_v53 = vld [vmem:[%s618_s1 + $0x120] sm:$0xff] }
  0x11   :  { %352 = vmatpush3.msra.mxu1 %v56_v27  ;;  %318 = vmatprep.subr.mxu0 %v39_v28  ;;  %v14_v54 = vld [vmem:[%s619_s0] sm:$0xff]  ;;  %v34_v55 = vld [vmem:[%s618_s1 + $0x98] sm:$0xff]  ;;  %v33_v60 = vld [vmem:[%s618_s1 + $0x90] sm:$0xff] }
  0x12   :  { %353 = vmatprep.subr.mxu1 %v71_v29  ;;  %319 = vmatpush3.msra.mxu0 %v23_v33  ;;  %v66_v56 = vld [vmem:[%s618_s1 + $0x198] sm:$0xff]  ;;  %v87_v57 = vcombine.high %v14_v54, %v14_v54  ;;  %v65_v61 = vld [vmem:[%s618_s1 + $0x190] sm:$0xff]  ;;  %v94_v62 = vrot.slane %v14_v54, %v93_v51  ;;  %v32_v2 = vld [vmem:[%s618_s1 + $0x88] sm:$0xff] }
  0x13   :  { %354 = vmatpush3.msra.mxu1 %v55_v34  ;;  %320 = vmatprep.subr.mxu0 %v38_v35  ;;  %v18_v58 = vld [vmem:[%s618_s1 + $0x18] sm:$0xff]  ;;  %v17_v63 = vld [vmem:[%s618_s1 + $0x10] sm:$0xff]  ;;  %v64_v3 = vld [vmem:[%s618_s1 + $0x188] sm:$0xff] }
  0x14   :  { %355 = vmatprep.subr.mxu1 %v70_v36  ;;  %321 = vmatpush3.msra.mxu0 %v22_v37  ;;  %v50_v59 = vld [vmem:[%s618_s1 + $0x118] sm:$0xff]  ;;  %v49_v0 = vld [vmem:[%s618_s1 + $0x110] sm:$0xff]  ;;  %v101_v1 = vrot.slane %v87_v57, %v93_v51  ;;  %v16_v4 = vld [vmem:[%s618_s1 + $0x8] sm:$0xff]  ;;  %v102_v8 = vcombine.high %v94_v62, %v94_v62 }
  0x15   :  { %356 = vmatpush3.msra.mxu1 %v54_v38  ;;  %322 = vmatprep.subr.mxu0 %v37_v39  ;;  %v48_v5 = vld [vmem:[%s618_s1 + $0x108] sm:$0xff]  ;;  %v31_v6 = vld [vmem:[%s618_s1 + $0x80] sm:$0xff] }
  0x16   :  { %357 = vmatprep.subr.mxu1 %v69_v40  ;;  %323 = vmatpush3.msra.mxu0 %v21_v43  ;;  %v63_v7 = vld [vmem:[%s618_s1 + $0x180] sm:$0xff]  ;;  %v103_v10 = vcombine.high %v101_v1, %v101_v1 }
  0x17   :  { %358 = vmatpush3.msra.mxu1 %v53_v44  ;;  %324 = vmatprep.subr.mxu0 %v36_v45  ;;  %v15_v9 = vld [vmem:[%s618_s1] sm:$0xff] }
  0x18   :  { %359 = vmatprep.subr.mxu1 %v68_v46  ;;  %325 = vmatpush3.msra.mxu0 %v20_v47  ;;  %v47_v11 = vld [vmem:[%s618_s1 + $0x100] sm:$0xff]  ;;  %s391_s1 = smov 118  }
  0x19   :  { %360 = vmatpush3.msra.mxu1 %v52_v48  ;;  %326 = vmatprep.subr.mxu0 %v35_v49  ;;  %v303_v14 = vld [vmem:[%s620_s2] ss:$0 sm:$0xff]  ;;  %s392_s2 = smov 108  }
  0x1a   :  { %361 = vmatprep.subr.mxu1 %v67_v50  ;;  %327 = vmatpush3.msra.mxu0 %v19_v52 }
  0x1b   :  { %362 = vmatpush3.msra.mxu1 %v51_v53  ;;  %328 = vmatprep.subr.mxu0 %v34_v55 }
  0x1c   :  { %363 = vmatprep.subr.mxu1 %v66_v56  ;;  %329 = vmatpush3.msra.mxu0 %v18_v58 }
  0x1d   :  { %364 = vmatpush3.msra.mxu1 %v50_v59  ;;  %330 = vmatprep.subr.mxu0 %v33_v60 }
  0x1e   :  { %365 = vmatprep.subr.mxu1 %v65_v61  ;;  %331 = vmatpush3.msra.mxu0 %v17_v63 }
  0x1f   :  { %366 = vmatpush3.msra.mxu1 %v49_v0  ;;  %332 = vmatprep.subr.mxu0 %v32_v2 }
  0x20   :  { %367 = vmatprep.subr.mxu1 %v64_v3  ;;  %333 = vmatpush3.msra.mxu0 %v16_v4 }
  0x21   :  { %368 = vmatpush3.msra.mxu1 %v48_v5  ;;  %334 = vmatprep.subr.mxu0 %v31_v6 }
  0x22   :  { %369 = vmatprep.subr.mxu1 %v63_v7  ;;  %335 = vmatpush3.msra.mxu0 %v15_v9 }
  0x23   :  { %172 = vmatprep.mubr.f32.mxu0 %v102_v8  ;;  %370 = vmatpush3.msra.mxu1 %v47_v11 }
  0x24   :  { %242 = vmatprep.mubr.f32.mxu1 %v103_v10  ;;  %173 = vmatmul.mubr.f32.vlgmr.msra.gmra.mxu0 %v94_v62 }
  0x25   :  { %243 = vmatmul.mubr.f32.vlgmr.msra.gmra.mxu1 %v101_v1 }
  0xe4   :  { %v336_v12 = vpop.f32.mrf.mxu0 }
  0xe5   :  { %v371_v13 = vpop.f32.mrf.mxu1 }
  0xe6   :  { %v337_v15 = vpop.f32.mrf.mxu0 }
  0xe7   :  { %v372_v16 = vpop.f32.mrf.mxu1  ;;  %v338_v17 = vadd.f32 %v337_v15, %v336_v12 }
  0xe8   :  { %v373_v19 = vadd.f32 %v372_v16, %v371_v13 }
  0xe9   :  { %v175_v18 = vadd.f32 %v338_v17, %v303_v14 }
  0xeb   :  { %v245_v20 = vadd.f32 %v373_v19, %v175_v18 }
  0xed   :  { %v261_v21 = vsel %vm260_vm0, %v245_v20, -inf  ;;  %v249_v22 = vsel %vm248_vm1, %v245_v20, -inf  ;;  %v277_v23 = vsel %vm276_vm2, %v245_v20, -inf }
  0xee   :  { %262 = vmax.xlane.f32.xlu0 %v261_v21  ;;  %250 = vmax.xlane.f32.xlu1 %v249_v22 }
  0xf2   :  { %278 = vmax.xlane.f32.xlu0 %v277_v23 }
 0x177   :  { %v263_v24 = vpop.xlane.xlu0 %262  ;;  %v251_v32 = vpop.xlane.xlu1 %250 }
 0x178   :  { %v264_v25 = vsub.f32 %v245_v20, %v263_v24  ;;  %v252_v33 = vsub.f32 %v245_v20, %v251_v32 }
 0x17a   :  { %v265_v26 = vmul.f32 1.442695, %v264_v25  ;;  %v253_v34 = vmul.f32 1.442695, %v252_v33 }
 0x17b   :  { %v279_v27 = vpop.xlane.xlu0 %278 }
 0x17c   :  { %378 = vpow2.f32 %v265_v26  ;;  %v280_v28 = vsub.f32 %v245_v20, %v279_v27 }
 0x17e   :  { %v281_v29 = vmul.f32 1.442695, %v280_v28 }
 0x180   :  { %380 = vpow2.f32 %v281_v29 }
 0x181   :  { %382 = vpow2.f32 %v253_v34 }
 0x189   :  { %v379_v30 = vpop.eup %378 }
 0x18a   :  { %268 = vrot.lane.b32.xlu1 %v379_v30, %s391_s1 }
 0x18d   :  { %v381_v31 = vpop.eup %380 }
 0x18e   :  { %284 = vrot.lane.b32.xlu0 %v381_v31, %s392_s2  ;;  %v383_v35 = vpop.eup %382 }
 0x18f   :  { %v255_v36 = vsel %vm248_vm1, %v383_v35, 0.0 }
 0x1ae   :  { %256 = vadd.xlane.f32.xlu1 %v255_v36 }
 0x1fc   :  { %v269_v37 = vpop.permute.xlu1 %268 }
 0x1fd   :  { %v271_v38 = vsel %vm248_vm1, %v269_v37, 0.0 }
 0x1fe   :  { %272 = vadd.xlane.f32.xlu0 %v271_v38 }
 0x200   :  { %v285_v39 = vpop.permute.xlu0 %284 }
 0x201   :  { %v287_v40 = vsel %vm248_vm1, %v285_v39, 0.0 }
 0x202   :  { %288 = vadd.xlane.f32.xlu1 %v287_v40 }
 0x237   :  { %v257_v41 = vpop.xlane.xlu1 %256 }
 0x287   :  { %v273_v42 = vpop.xlane.xlu0 %272 }
 0x288   :  { %384 = vrcp.f32 %v273_v42 }
 0x289   :  { %386 = vrcp.f32 %v257_v41 }
 0x28b   :  { %v289_v43 = vpop.xlane.xlu1 %288 }
 0x28c   :  { %388 = vrcp.f32 %v289_v43 }
 0x295   :  { %v385_v44 = vpop.eup %384 }
 0x296   :  { %v387_v45 = vpop.eup %386  ;;  %v275_v46 = vmul.f32 %v385_v44, %v379_v30 }
 0x297   :  { %v259_v48 = vmul.f32 %v387_v45, %v383_v35 }
 0x299   :  { %v389_v47 = vpop.eup %388  ;;  %v293_v50 = vsel %vm292_vm3, %v259_v48, %v275_v46 }
 0x29a   :  { %v291_v49 = vmul.f32 %v389_v47, %v381_v31 }
 0x29c   :  { %v295_v51 = vsel %vm294_vm4, %v293_v50, %v291_v49 }
 0x29d   :  { %v297_v52 = vsel %vm296_vm5, %v295_v51, 0.0 }
 0x29e   :  { %298 = vst [vmem:[%s621_s3] sm:$0x3] %v297_v52 }

</bundles_post_ra>
